<compile_context>
chip_gen: v6e
topology: v6e:2x2x1
jax: 0.10.0
libtpu: 0.0.40
codegen_flags: <defaults>
</compile_context>

<pallas_src>
import jax
import jax.numpy as jnp
import numpy as np
from jax import lax
from jax.experimental import pallas as pl
from jax.experimental.pallas import tpu as pltpu


def lstm_encoder_kernel(x_ref, wih_ref, whh_ref, b_ref,
                        w1h_ref, w1c_ref, b1_ref, wl_ref, bl_ref,
                        out_ref, gin_sc, h_sc, c_sc):
    """One (batch_block, time_chunk) grid step.

    x_ref    : (Tc, Bb, I) bf16, time-major chunk of this batch block
    gin_sc   : (Tc*Bb, 4H) f32 scratch — hoisted input projection
    h_sc/c_sc: (Bb, H)     f32 scratch — recurrent state carried across chunks
    out_ref  : (1, Bb, L)  f32 — written only on the last time chunk
    """
    H = whh_ref.shape[0]
    Tc, Bb, _ = x_ref.shape
    t_idx = pl.program_id(1)

    # Reset the recurrent state at the first time chunk of every batch block.
    @pl.when(t_idx == 0)
    def _():
        h_sc[...] = jnp.zeros_like(h_sc)
        c_sc[...] = jnp.zeros_like(c_sc)

    # --- (1) Input projection for the whole chunk, hoisted out of the serial
    #     h-dependent chain.  Per-timestep (Bb, I) @ (I, 4H) keeps every slice
    #     an aligned tile (no in-kernel relayout of the x block).
    wih = wih_ref[...]
    bias = b_ref[...]

    def proj(tt, carry):
        row = pl.multiple_of(tt * Bb, 8)          # Bb is a multiple of 16
        gin_sc[pl.ds(row, Bb), :] = (
            jnp.dot(x_ref[tt], wih, preferred_element_type=jnp.float32) + bias)
        return carry

    lax.fori_loop(0, Tc, proj, 0, unroll=True)

    # --- (2) Serial recurrence: one (Bb, H) @ (H, 4H) bf16 matmul plus gate
    #     nonlinearities per step.  Gate columns are packed [i | f | o | g]:
    #     a single sigmoid over 3H lanes and a single tanh over H lanes.
    whh = whh_ref[...]
    h0 = h_sc[...]
    c0 = c_sc[...]

    def step(tt, carry):
        h, c = carry
        row = pl.multiple_of(tt * Bb, 8)
        gates = (gin_sc[pl.ds(row, Bb), :]
                 + jnp.dot(h.astype(jnp.bfloat16), whh,
                           preferred_element_type=jnp.float32))
        sig = jax.nn.sigmoid(gates[:, :3 * H])
        g_g = jnp.tanh(gates[:, 3 * H:])
        i_g = sig[:, 0 * H:1 * H]
        f_g = sig[:, 1 * H:2 * H]
        o_g = sig[:, 2 * H:3 * H]
        c = f_g * c + i_g * g_g
        h = o_g * jnp.tanh(c)
        return (h, c)

    h, c = lax.fori_loop(0, Tc, step, (h0, c0), unroll=True)
    h_sc[...] = h
    c_sc[...] = c

    # --- (3) Encoder head on the final state only (fc1 split into its h / c
    #     halves; algebraically identical to concat([h, c]) @ W_fc1^T).
    @pl.when(t_idx == pl.num_programs(1) - 1)
    def _():
        lat = (jnp.dot(h.astype(jnp.bfloat16), w1h_ref[...],
                       preferred_element_type=jnp.float32)
               + jnp.dot(c.astype(jnp.bfloat16), w1c_ref[...],
                         preferred_element_type=jnp.float32)
               + b1_ref[...])
        lat = (jnp.dot(lat.astype(jnp.bfloat16), wl_ref[...],
                       preferred_element_type=jnp.float32)
               + bl_ref[...])
        out_ref[0] = lat.astype(out_ref.dtype)


def prepare_encoder_params(params):
    """One-time parameter prep: gate reorder [i,f,g,o] -> [i,f,o,g],
    transposes, bias fold, and bf16 weight cast (f32 accumulation in-kernel)."""
    H = params["w_hh"].shape[1]

    def reorder(w):  # first axis is the packed 4H gate axis
        return jnp.concatenate([w[:2 * H], w[3 * H:4 * H], w[2 * H:3 * H]],
                               axis=0)

    bias = reorder(params["b_ih"] + params["b_hh"]).reshape(1, 4 * H)
    return {
        "wih_t": reorder(jnp.asarray(params["w_ih"])).T.astype(jnp.bfloat16),
        "whh_t": reorder(jnp.asarray(params["w_hh"])).T.astype(jnp.bfloat16),
        "bias": bias.astype(jnp.float32),
        "w1h_t": jnp.asarray(params["w_fc1"][:, :H]).T.astype(jnp.bfloat16),
        "w1c_t": jnp.asarray(params["w_fc1"][:, H:]).T.astype(jnp.bfloat16),
        "b_fc1": params["b_fc1"].reshape(1, H).astype(jnp.float32),
        "wl_t": jnp.asarray(params["w_lat"]).T.astype(jnp.bfloat16),
        "b_lat": params["b_lat"].reshape(1, -1).astype(jnp.float32),
    }


def _pick_time_chunk(seq_len, max_chunk):
    c = max(1, min(seq_len, max_chunk))
    while seq_len % c:
        c -= 1
    return c


def rnn_encoder_forward(x, prepped, *, time_chunk=16, batch_block=None):
    """x: (B, S, I) float32 (PyTorch module input layout).
    Returns latent_vec of shape (1, B, latent_size) in float32."""
    B, S, I = x.shape
    H = prepped["whh_t"].shape[0]
    L = prepped["wl_t"].shape[1]

    # Pad batch to a multiple of 16 sublanes (bf16 x tiles), go time-major,
    # cast once.  Padded rows stay finite and are sliced off at the end.
    Bp = ((B + 15) // 16) * 16
    if Bp != B:
        x = jnp.pad(x, ((0, Bp - B), (0, 0), (0, 0)))
    x_tm = jnp.transpose(x, (1, 0, 2)).astype(jnp.bfloat16)      # (S, Bp, I)

    if batch_block is None:
        batch_block = Bp        # set Bp // 2 to split across v7x's two cores
    assert Bp % batch_block == 0 and batch_block % 16 == 0
    Tc = _pick_time_chunk(S, time_chunk)
    grid = (Bp // batch_block, S // Tc)

    # Explicit scoped-VMEM budget from the actual footprint (double-buffered
    # x / out / weights + scratch), clamped to sane per-generation bounds.
    def nbytes(shape, dtype):
        return int(np.prod(shape)) * jnp.dtype(dtype).itemsize

    footprint = (
        2 * nbytes((Tc, batch_block, I), jnp.bfloat16)
        + 2 * nbytes((1, batch_block, L), jnp.float32)
        + 2 * (nbytes((I, 4 * H), jnp.bfloat16)
               + nbytes((H, 4 * H), jnp.bfloat16)
               + nbytes((1, 4 * H), jnp.float32)
               + 2 * nbytes((H, H), jnp.bfloat16)
               + nbytes((1, H), jnp.float32)
               + nbytes((H, L), jnp.bfloat16)
               + nbytes((1, L), jnp.float32))
        + nbytes((Tc * batch_block, 4 * H), jnp.float32)
        + 2 * nbytes((batch_block, H), jnp.float32))
    vmem_limit = int(min(110 << 20, max(32 << 20, 2 * footprint + (4 << 20))))

    out = pl.pallas_call(
        lstm_encoder_kernel,
        out_shape=jax.ShapeDtypeStruct((1, Bp, L), jnp.float32),
        grid_spec=pltpu.PrefetchScalarGridSpec(
            num_scalar_prefetch=0,
            grid=grid,
            in_specs=[
                pl.BlockSpec((Tc, batch_block, I), lambda b, t: (t, b, 0)),  # x chunk
                pl.BlockSpec((I, 4 * H), lambda b, t: (0, 0)),   # W_ih^T (bf16)
                pl.BlockSpec((H, 4 * H), lambda b, t: (0, 0)),   # W_hh^T (bf16)
                pl.BlockSpec((1, 4 * H), lambda b, t: (0, 0)),   # b_ih + b_hh
                pl.BlockSpec((H, H), lambda b, t: (0, 0)),       # fc1 h-half^T
                pl.BlockSpec((H, H), lambda b, t: (0, 0)),       # fc1 c-half^T
                pl.BlockSpec((1, H), lambda b, t: (0, 0)),       # b_fc1
                pl.BlockSpec((H, L), lambda b, t: (0, 0)),       # W_lat^T
                pl.BlockSpec((1, L), lambda b, t: (0, 0)),       # b_lat
            ],
            out_specs=pl.BlockSpec((1, batch_block, L), lambda b, t: (0, b, 0)),
            scratch_shapes=[
                pltpu.VMEM((Tc * batch_block, 4 * H), jnp.float32),  # gates_in
                pltpu.VMEM((batch_block, H), jnp.float32),           # h carry
                pltpu.VMEM((batch_block, H), jnp.float32),           # c carry
            ],
        ),
        compiler_params=pltpu.CompilerParams(
            dimension_semantics=("parallel", "arbitrary"),
            vmem_limit_bytes=vmem_limit),
    )(x_tm, prepped["wih_t"], prepped["whh_t"], prepped["bias"],
      prepped["w1h_t"], prepped["w1c_t"], prepped["b_fc1"],
      prepped["wl_t"], prepped["b_lat"])

    return out[:, :B, :]


def reference_forward(x, params):
    """Pure-JAX f32 reference of the same forward pass (correctness check)."""
    B, S, I = x.shape
    H = params["w_hh"].shape[1]
    x_tm = jnp.transpose(x, (1, 0, 2))
    wih_t = params["w_ih"].T
    whh_t = params["w_hh"].T
    bias = params["b_ih"] + params["b_hh"]

    def step(carry, x_t):
        h, c = carry
        gates = x_t @ wih_t + h @ whh_t + bias
        i_g = jax.nn.sigmoid(gates[:, 0 * H:1 * H])
        f_g = jax.nn.sigmoid(gates[:, 1 * H:2 * H])
        g_g = jnp.tanh(gates[:, 2 * H:3 * H])
        o_g = jax.nn.sigmoid(gates[:, 3 * H:4 * H])
        c = f_g * c + i_g * g_g
        h = o_g * jnp.tanh(c)
        return (h, c), None

    h0 = jnp.zeros((B, H), jnp.float32)
    c0 = jnp.zeros((B, H), jnp.float32)
    (h, c), _ = lax.scan(step, (h0, c0), x_tm)
    states = jnp.concatenate([h, c], axis=-1)
    lat = states @ params["w_fc1"].T + params["b_fc1"]
    lat = lat @ params["w_lat"].T + params["b_lat"]
    return lat[None, :, :]


if __name__ == "__main__":
    # Small shapes consistent with the module's forward.
    B, S, I, H, L = 4, 8, 16, 32, 16

    key = jax.random.PRNGKey(0)
    keys = jax.random.split(key, 9)

    def init(k, shape):
        return (0.1 * jax.random.normal(k, shape)).astype(jnp.float32)

    params = {
        "w_ih": init(keys[0], (4 * H, I)),     # nn.LSTM weight_ih_l0
        "w_hh": init(keys[1], (4 * H, H)),     # nn.LSTM weight_hh_l0
        "b_ih": init(keys[2], (4 * H,)),
        "b_hh": init(keys[3], (4 * H,)),
        "w_fc1": init(keys[4], (H, 2 * H)),    # fc1: Linear(2H -> H)
        "b_fc1": init(keys[5], (H,)),
        "w_lat": init(keys[6], (L, H)),        # latent: Linear(H -> L)
        "b_lat": init(keys[7], (L,)),
    }
    x = jax.random.normal(keys[8], (B, S, I), dtype=jnp.float32)

    prepped = prepare_encoder_params(params)   # one-time weight prep
    # time_chunk=4 -> grid (1, 2): exercises the chunked recurrence with the
    # h/c state carried in VMEM scratch across grid steps.
    out = rnn_encoder_forward(x, prepped, time_chunk=4)
    out = jax.block_until_ready(out)

    ref = jax.block_until_ready(reference_forward(x, params))
    assert out.shape == (1, B, L), out.shape
    # Tolerances relaxed for bf16 weights/activations (f32 accumulation).
    np.testing.assert_allclose(np.asarray(out), np.asarray(ref),
                               rtol=2e-2, atol=2e-2)
    print("KERNEL_OK")
</pallas_src>

<mosaic_0001>
module attributes {stable_mosaic.version = 11 : i64} {
  func.func @lstm_encoder_kernel(%arg0: i32, %arg1: i32, %arg2: memref<4x16x16xbf16, #tpu.memory_space<vmem>>, %arg3: memref<16x128xbf16, #tpu.memory_space<vmem>>, %arg4: memref<32x128xbf16, #tpu.memory_space<vmem>>, %arg5: memref<1x128xf32, #tpu.memory_space<vmem>>, %arg6: memref<32x32xbf16, #tpu.memory_space<vmem>>, %arg7: memref<32x32xbf16, #tpu.memory_space<vmem>>, %arg8: memref<1x32xf32, #tpu.memory_space<vmem>>, %arg9: memref<32x16xbf16, #tpu.memory_space<vmem>>, %arg10: memref<1x16xf32, #tpu.memory_space<vmem>>, %arg11: memref<1x16x16xf32, #tpu.memory_space<vmem>>, %arg12: memref<64x128xf32, #tpu.memory_space<vmem>>, %arg13: memref<16x32xf32, #tpu.memory_space<vmem>>, %arg14: memref<16x32xf32, #tpu.memory_space<vmem>>) attributes {dimension_semantics = [#tpu.dimension_semantics<parallel>, #tpu.dimension_semantics<arbitrary>], iteration_bounds = array<i64: 1, 2>, scalar_prefetch = 0 : i64, scratch_operands = 3 : i64, tpu.core_type = #tpu.core_type<tc>, window_params = [{transform_indices = @transform_0, window_bounds = array<i64: 4, 16, 16>}, {pipeline_mode = #tpu.pipeline_mode<synchronous>, transform_indices = @transform_1, window_bounds = array<i64: 16, 128>}, {pipeline_mode = #tpu.pipeline_mode<synchronous>, transform_indices = @transform_2, window_bounds = array<i64: 32, 128>}, {pipeline_mode = #tpu.pipeline_mode<synchronous>, transform_indices = @transform_3, window_bounds = array<i64: 1, 128>}, {pipeline_mode = #tpu.pipeline_mode<synchronous>, transform_indices = @transform_4, window_bounds = array<i64: 32, 32>}, {pipeline_mode = #tpu.pipeline_mode<synchronous>, transform_indices = @transform_5, window_bounds = array<i64: 32, 32>}, {pipeline_mode = #tpu.pipeline_mode<synchronous>, transform_indices = @transform_6, window_bounds = array<i64: 1, 32>}, {pipeline_mode = #tpu.pipeline_mode<synchronous>, transform_indices = @transform_7, window_bounds = array<i64: 32, 16>}, {pipeline_mode = #tpu.pipeline_mode<synchronous>, transform_indices = @transform_8, window_bounds = array<i64: 1, 16>}, {transform_indices = @transform_9, window_bounds = array<i64: 1, 16, 16>}]} {
    %c0_i32 = arith.constant 0 : i32
    %0 = arith.cmpi eq, %arg1, %c0_i32 : i32
    %1 = arith.extui %0 : i1 to i32
    %c0_i32_0 = arith.constant 0 : i32
    %2 = arith.cmpi ne, %1, %c0_i32_0 : i32
    scf.if %2 {
      %cst_56 = arith.constant 0.000000e+00 : f32
      %145 = vector.broadcast %cst_56 : f32 to vector<16x32xf32>
      %c0_57 = arith.constant 0 : index
      %c0_58 = arith.constant 0 : index
      %146 = vector.load %arg13[%c0_57, %c0_58] : memref<16x32xf32, #tpu.memory_space<vmem>>, vector<16x32xf32>
      tpu.vector_store %arg13[%c0_57, %c0_58], %145 {strides = array<i32>} : memref<16x32xf32, #tpu.memory_space<vmem>>, vector<16x32xf32>,
      %cst_59 = arith.constant 0.000000e+00 : f32
      %147 = vector.broadcast %cst_59 : f32 to vector<16x32xf32>
      %c0_60 = arith.constant 0 : index
      %c0_61 = arith.constant 0 : index
      %148 = vector.load %arg14[%c0_60, %c0_61] : memref<16x32xf32, #tpu.memory_space<vmem>>, vector<16x32xf32>
      tpu.vector_store %arg14[%c0_60, %c0_61], %147 {strides = array<i32>} : memref<16x32xf32, #tpu.memory_space<vmem>>, vector<16x32xf32>,
    } else {
    }
    %c0 = arith.constant 0 : index
    %c0_1 = arith.constant 0 : index
    %3 = vector.load %arg3[%c0, %c0_1] : memref<16x128xbf16, #tpu.memory_space<vmem>>, vector<16x128xbf16>
    %c0_2 = arith.constant 0 : index
    %c0_3 = arith.constant 0 : index
    %4 = vector.load %arg5[%c0_2, %c0_3] : memref<1x128xf32, #tpu.memory_space<vmem>>, vector<1x128xf32>
    %c0_i32_4 = arith.constant 0 : i32
    %c16_i32 = arith.constant 16 : i32
    %5 = arith.muli %c0_i32_4, %c16_i32 : i32
    %6 = tpu.assume_multiple %5, 8 : i32
    %7 = arith.index_cast %c0_i32_4 : i32 to index
    %c0_5 = arith.constant 0 : index
    %c0_6 = arith.constant 0 : index
    %8 = vector.load %arg2[%7, %c0_5, %c0_6] : memref<4x16x16xbf16, #tpu.memory_space<vmem>>, vector<1x16x16xbf16>
    %9 = vector.shape_cast %8 : vector<1x16x16xbf16> to vector<16x16xbf16>
    %cst = arith.constant dense<0.000000e+00> : vector<16x128xf32>
    %10 = tpu.matmul %9, %3, %cst {dimension_numbers = #tpu.dot_dimension_numbers<[1], [0], [0], [1], [0, 0, 1, 1], [], []>} : vector<16x16xbf16>, vector<16x128xbf16>, vector<16x128xf32> -> vector<16x128xf32>
    %11 = vector.broadcast %4 : vector<1x128xf32> to vector<16x128xf32>
    %12 = arith.addf %10, %11 : vector<16x128xf32>
    %13 = arith.index_cast %6 : i32 to index
    %c0_7 = arith.constant 0 : index
    %14 = vector.load %arg12[%13, %c0_7] : memref<64x128xf32, #tpu.memory_space<vmem>>, vector<16x128xf32>
    tpu.vector_store %arg12[%13, %c0_7], %12 {strides = array<i32>} : memref<64x128xf32, #tpu.memory_space<vmem>>, vector<16x128xf32>,
    %c1_i32 = arith.constant 1 : i32
    %c16_i32_8 = arith.constant 16 : i32
    %15 = arith.muli %c1_i32, %c16_i32_8 : i32
    %16 = tpu.assume_multiple %15, 8 : i32
    %17 = arith.index_cast %c1_i32 : i32 to index
    %c0_9 = arith.constant 0 : index
    %c0_10 = arith.constant 0 : index
    %18 = vector.load %arg2[%17, %c0_9, %c0_10] : memref<4x16x16xbf16, #tpu.memory_space<vmem>>, vector<1x16x16xbf16>
    %19 = vector.shape_cast %18 : vector<1x16x16xbf16> to vector<16x16xbf16>
    %cst_11 = arith.constant dense<0.000000e+00> : vector<16x128xf32>
    %20 = tpu.matmul %19, %3, %cst_11 {dimension_numbers = #tpu.dot_dimension_numbers<[1], [0], [0], [1], [0, 0, 1, 1], [], []>} : vector<16x16xbf16>, vector<16x128xbf16>, vector<16x128xf32> -> vector<16x128xf32>
    %21 = vector.broadcast %4 : vector<1x128xf32> to vector<16x128xf32>
    %22 = arith.addf %20, %21 : vector<16x128xf32>
    %23 = arith.index_cast %16 : i32 to index
    %c0_12 = arith.constant 0 : index
    %24 = vector.load %arg12[%23, %c0_12] : memref<64x128xf32, #tpu.memory_space<vmem>>, vector<16x128xf32>
    tpu.vector_store %arg12[%23, %c0_12], %22 {strides = array<i32>} : memref<64x128xf32, #tpu.memory_space<vmem>>, vector<16x128xf32>,
    %c2_i32 = arith.constant 2 : i32
    %c16_i32_13 = arith.constant 16 : i32
    %25 = arith.muli %c2_i32, %c16_i32_13 : i32
    %26 = tpu.assume_multiple %25, 8 : i32
    %27 = arith.index_cast %c2_i32 : i32 to index
    %c0_14 = arith.constant 0 : index
    %c0_15 = arith.constant 0 : index
    %28 = vector.load %arg2[%27, %c0_14, %c0_15] : memref<4x16x16xbf16, #tpu.memory_space<vmem>>, vector<1x16x16xbf16>
    %29 = vector.shape_cast %28 : vector<1x16x16xbf16> to vector<16x16xbf16>
    %cst_16 = arith.constant dense<0.000000e+00> : vector<16x128xf32>
    %30 = tpu.matmul %29, %3, %cst_16 {dimension_numbers = #tpu.dot_dimension_numbers<[1], [0], [0], [1], [0, 0, 1, 1], [], []>} : vector<16x16xbf16>, vector<16x128xbf16>, vector<16x128xf32> -> vector<16x128xf32>
    %31 = vector.broadcast %4 : vector<1x128xf32> to vector<16x128xf32>
    %32 = arith.addf %30, %31 : vector<16x128xf32>
    %33 = arith.index_cast %26 : i32 to index
    %c0_17 = arith.constant 0 : index
    %34 = vector.load %arg12[%33, %c0_17] : memref<64x128xf32, #tpu.memory_space<vmem>>, vector<16x128xf32>
    tpu.vector_store %arg12[%33, %c0_17], %32 {strides = array<i32>} : memref<64x128xf32, #tpu.memory_space<vmem>>, vector<16x128xf32>,
    %c3_i32 = arith.constant 3 : i32
    %c16_i32_18 = arith.constant 16 : i32
    %35 = arith.muli %c3_i32, %c16_i32_18 : i32
    %36 = tpu.assume_multiple %35, 8 : i32
    %37 = arith.index_cast %c3_i32 : i32 to index
    %c0_19 = arith.constant 0 : index
    %c0_20 = arith.constant 0 : index
    %38 = vector.load %arg2[%37, %c0_19, %c0_20] : memref<4x16x16xbf16, #tpu.memory_space<vmem>>, vector<1x16x16xbf16>
    %39 = vector.shape_cast %38 : vector<1x16x16xbf16> to vector<16x16xbf16>
    %cst_21 = arith.constant dense<0.000000e+00> : vector<16x128xf32>
    %40 = tpu.matmul %39, %3, %cst_21 {dimension_numbers = #tpu.dot_dimension_numbers<[1], [0], [0], [1], [0, 0, 1, 1], [], []>} : vector<16x16xbf16>, vector<16x128xbf16>, vector<16x128xf32> -> vector<16x128xf32>
    %41 = vector.broadcast %4 : vector<1x128xf32> to vector<16x128xf32>
    %42 = arith.addf %40, %41 : vector<16x128xf32>
    %43 = arith.index_cast %36 : i32 to index
    %c0_22 = arith.constant 0 : index
    %44 = vector.load %arg12[%43, %c0_22] : memref<64x128xf32, #tpu.memory_space<vmem>>, vector<16x128xf32>
    tpu.vector_store %arg12[%43, %c0_22], %42 {strides = array<i32>} : memref<64x128xf32, #tpu.memory_space<vmem>>, vector<16x128xf32>,
    %c4_i32 = arith.constant 4 : i32
    %c0_23 = arith.constant 0 : index
    %c0_24 = arith.constant 0 : index
    %45 = vector.load %arg4[%c0_23, %c0_24] : memref<32x128xbf16, #tpu.memory_space<vmem>>, vector<32x128xbf16>
    %c0_25 = arith.constant 0 : index
    %c0_26 = arith.constant 0 : index
    %46 = vector.load %arg13[%c0_25, %c0_26] : memref<16x32xf32, #tpu.memory_space<vmem>>, vector<16x32xf32>
    %c0_27 = arith.constant 0 : index
    %c0_28 = arith.constant 0 : index
    %47 = vector.load %arg14[%c0_27, %c0_28] : memref<16x32xf32, #tpu.memory_space<vmem>>, vector<16x32xf32>
    %c0_i32_29 = arith.constant 0 : i32
    %c16_i32_30 = arith.constant 16 : i32
    %48 = arith.muli %c0_i32_29, %c16_i32_30 : i32
    %49 = tpu.assume_multiple %48, 8 : i32
    %50 = arith.index_cast %49 : i32 to index
    %c0_31 = arith.constant 0 : index
    %51 = vector.load %arg12[%50, %c0_31] : memref<64x128xf32, #tpu.memory_space<vmem>>, vector<16x128xf32>
    %52 = arith.truncf %46 : vector<16x32xf32> to vector<16x32xbf16>
    %cst_32 = arith.constant dense<0.000000e+00> : vector<16x128xf32>
    %53 = tpu.matmul %52, %45, %cst_32 {dimension_numbers = #tpu.dot_dimension_numbers<[1], [0], [0], [1], [0, 0, 1, 1], [], []>} : vector<16x32xbf16>, vector<32x128xbf16>, vector<16x128xf32> -> vector<16x128xf32>
    %54 = arith.addf %51, %53 : vector<16x128xf32>
    %55 = vector.extract_strided_slice %54 {offsets = [0, 0], sizes = [16, 96], strides = [1, 1]} : vector<16x128xf32> to vector<16x96xf32>
    %56 = arith.negf %55 : vector<16x96xf32>
    %57 = math.exp %56 : vector<16x96xf32>
    %cst_33 = arith.constant 1.000000e+00 : f32
    %58 = vector.broadcast %cst_33 : f32 to vector<16x96xf32>
    %59 = arith.addf %58, %57 : vector<16x96xf32>
    %60 = arith.divf %58, %59 : vector<16x96xf32>
    %61 = vector.extract_strided_slice %54 {offsets = [0, 96], sizes = [16, 32], strides = [1, 1]} : vector<16x128xf32> to vector<16x32xf32>
    %62 = math.tanh %61 : vector<16x32xf32>
    %63 = vector.extract_strided_slice %60 {offsets = [0, 0], sizes = [16, 32], strides = [1, 1]} : vector<16x96xf32> to vector<16x32xf32>
    %64 = vector.extract_strided_slice %60 {offsets = [0, 32], sizes = [16, 32], strides = [1, 1]} : vector<16x96xf32> to vector<16x32xf32>
    %65 = vector.extract_strided_slice %60 {offsets = [0, 64], sizes = [16, 32], strides = [1, 1]} : vector<16x96xf32> to vector<16x32xf32>
    %66 = arith.mulf %64, %47 : vector<16x32xf32>
    %67 = arith.mulf %63, %62 : vector<16x32xf32>
    %68 = arith.addf %66, %67 : vector<16x32xf32>
    %69 = math.tanh %68 : vector<16x32xf32>
    %70 = arith.mulf %65, %69 : vector<16x32xf32>
    %c1_i32_34 = arith.constant 1 : i32
    %c16_i32_35 = arith.constant 16 : i32
    %71 = arith.muli %c1_i32_34, %c16_i32_35 : i32
    %72 = tpu.assume_multiple %71, 8 : i32
    %73 = arith.index_cast %72 : i32 to index
    %c0_36 = arith.constant 0 : index
    %74 = vector.load %arg12[%73, %c0_36] : memref<64x128xf32, #tpu.memory_space<vmem>>, vector<16x128xf32>
    %75 = arith.truncf %70 : vector<16x32xf32> to vector<16x32xbf16>
    %cst_37 = arith.constant dense<0.000000e+00> : vector<16x128xf32>
    %76 = tpu.matmul %75, %45, %cst_37 {dimension_numbers = #tpu.dot_dimension_numbers<[1], [0], [0], [1], [0, 0, 1, 1], [], []>} : vector<16x32xbf16>, vector<32x128xbf16>, vector<16x128xf32> -> vector<16x128xf32>
    %77 = arith.addf %74, %76 : vector<16x128xf32>
    %78 = vector.extract_strided_slice %77 {offsets = [0, 0], sizes = [16, 96], strides = [1, 1]} : vector<16x128xf32> to vector<16x96xf32>
    %79 = arith.negf %78 : vector<16x96xf32>
    %80 = math.exp %79 : vector<16x96xf32>
    %cst_38 = arith.constant 1.000000e+00 : f32
    %81 = vector.broadcast %cst_38 : f32 to vector<16x96xf32>
    %82 = arith.addf %81, %80 : vector<16x96xf32>
    %83 = arith.divf %81, %82 : vector<16x96xf32>
    %84 = vector.extract_strided_slice %77 {offsets = [0, 96], sizes = [16, 32], strides = [1, 1]} : vector<16x128xf32> to vector<16x32xf32>
    %85 = math.tanh %84 : vector<16x32xf32>
    %86 = vector.extract_strided_slice %83 {offsets = [0, 0], sizes = [16, 32], strides = [1, 1]} : vector<16x96xf32> to vector<16x32xf32>
    %87 = vector.extract_strided_slice %83 {offsets = [0, 32], sizes = [16, 32], strides = [1, 1]} : vector<16x96xf32> to vector<16x32xf32>
    %88 = vector.extract_strided_slice %83 {offsets = [0, 64], sizes = [16, 32], strides = [1, 1]} : vector<16x96xf32> to vector<16x32xf32>
    %89 = arith.mulf %87, %68 : vector<16x32xf32>
    %90 = arith.mulf %86, %85 : vector<16x32xf32>
    %91 = arith.addf %89, %90 : vector<16x32xf32>
    %92 = math.tanh %91 : vector<16x32xf32>
    %93 = arith.mulf %88, %92 : vector<16x32xf32>
    %c2_i32_39 = arith.constant 2 : i32
    %c16_i32_40 = arith.constant 16 : i32
    %94 = arith.muli %c2_i32_39, %c16_i32_40 : i32
    %95 = tpu.assume_multiple %94, 8 : i32
    %96 = arith.index_cast %95 : i32 to index
    %c0_41 = arith.constant 0 : index
    %97 = vector.load %arg12[%96, %c0_41] : memref<64x128xf32, #tpu.memory_space<vmem>>, vector<16x128xf32>
    %98 = arith.truncf %93 : vector<16x32xf32> to vector<16x32xbf16>
    %cst_42 = arith.constant dense<0.000000e+00> : vector<16x128xf32>
    %99 = tpu.matmul %98, %45, %cst_42 {dimension_numbers = #tpu.dot_dimension_numbers<[1], [0], [0], [1], [0, 0, 1, 1], [], []>} : vector<16x32xbf16>, vector<32x128xbf16>, vector<16x128xf32> -> vector<16x128xf32>
    %100 = arith.addf %97, %99 : vector<16x128xf32>
    %101 = vector.extract_strided_slice %100 {offsets = [0, 0], sizes = [16, 96], strides = [1, 1]} : vector<16x128xf32> to vector<16x96xf32>
    %102 = arith.negf %101 : vector<16x96xf32>
    %103 = math.exp %102 : vector<16x96xf32>
    %cst_43 = arith.constant 1.000000e+00 : f32
    %104 = vector.broadcast %cst_43 : f32 to vector<16x96xf32>
    %105 = arith.addf %104, %103 : vector<16x96xf32>
    %106 = arith.divf %104, %105 : vector<16x96xf32>
    %107 = vector.extract_strided_slice %100 {offsets = [0, 96], sizes = [16, 32], strides = [1, 1]} : vector<16x128xf32> to vector<16x32xf32>
    %108 = math.tanh %107 : vector<16x32xf32>
    %109 = vector.extract_strided_slice %106 {offsets = [0, 0], sizes = [16, 32], strides = [1, 1]} : vector<16x96xf32> to vector<16x32xf32>
    %110 = vector.extract_strided_slice %106 {offsets = [0, 32], sizes = [16, 32], strides = [1, 1]} : vector<16x96xf32> to vector<16x32xf32>
    %111 = vector.extract_strided_slice %106 {offsets = [0, 64], sizes = [16, 32], strides = [1, 1]} : vector<16x96xf32> to vector<16x32xf32>
    %112 = arith.mulf %110, %91 : vector<16x32xf32>
    %113 = arith.mulf %109, %108 : vector<16x32xf32>
    %114 = arith.addf %112, %113 : vector<16x32xf32>
    %115 = math.tanh %114 : vector<16x32xf32>
    %116 = arith.mulf %111, %115 : vector<16x32xf32>
    %c3_i32_44 = arith.constant 3 : i32
    %c16_i32_45 = arith.constant 16 : i32
    %117 = arith.muli %c3_i32_44, %c16_i32_45 : i32
    %118 = tpu.assume_multiple %117, 8 : i32
    %119 = arith.index_cast %118 : i32 to index
    %c0_46 = arith.constant 0 : index
    %120 = vector.load %arg12[%119, %c0_46] : memref<64x128xf32, #tpu.memory_space<vmem>>, vector<16x128xf32>
    %121 = arith.truncf %116 : vector<16x32xf32> to vector<16x32xbf16>
    %cst_47 = arith.constant dense<0.000000e+00> : vector<16x128xf32>
    %122 = tpu.matmul %121, %45, %cst_47 {dimension_numbers = #tpu.dot_dimension_numbers<[1], [0], [0], [1], [0, 0, 1, 1], [], []>} : vector<16x32xbf16>, vector<32x128xbf16>, vector<16x128xf32> -> vector<16x128xf32>
    %123 = arith.addf %120, %122 : vector<16x128xf32>
    %124 = vector.extract_strided_slice %123 {offsets = [0, 0], sizes = [16, 96], strides = [1, 1]} : vector<16x128xf32> to vector<16x96xf32>
    %125 = arith.negf %124 : vector<16x96xf32>
    %126 = math.exp %125 : vector<16x96xf32>
    %cst_48 = arith.constant 1.000000e+00 : f32
    %127 = vector.broadcast %cst_48 : f32 to vector<16x96xf32>
    %128 = arith.addf %127, %126 : vector<16x96xf32>
    %129 = arith.divf %127, %128 : vector<16x96xf32>
    %130 = vector.extract_strided_slice %123 {offsets = [0, 96], sizes = [16, 32], strides = [1, 1]} : vector<16x128xf32> to vector<16x32xf32>
    %131 = math.tanh %130 : vector<16x32xf32>
    %132 = vector.extract_strided_slice %129 {offsets = [0, 0], sizes = [16, 32], strides = [1, 1]} : vector<16x96xf32> to vector<16x32xf32>
    %133 = vector.extract_strided_slice %129 {offsets = [0, 32], sizes = [16, 32], strides = [1, 1]} : vector<16x96xf32> to vector<16x32xf32>
    %134 = vector.extract_strided_slice %129 {offsets = [0, 64], sizes = [16, 32], strides = [1, 1]} : vector<16x96xf32> to vector<16x32xf32>
    %135 = arith.mulf %133, %114 : vector<16x32xf32>
    %136 = arith.mulf %132, %131 : vector<16x32xf32>
    %137 = arith.addf %135, %136 : vector<16x32xf32>
    %138 = math.tanh %137 : vector<16x32xf32>
    %139 = arith.mulf %134, %138 : vector<16x32xf32>
    %c4_i32_49 = arith.constant 4 : i32
    %c0_50 = arith.constant 0 : index
    %c0_51 = arith.constant 0 : index
    %140 = vector.load %arg13[%c0_50, %c0_51] : memref<16x32xf32, #tpu.memory_space<vmem>>, vector<16x32xf32>
    tpu.vector_store %arg13[%c0_50, %c0_51], %139 {strides = array<i32>} : memref<16x32xf32, #tpu.memory_space<vmem>>, vector<16x32xf32>,
    %c0_52 = arith.constant 0 : index
    %c0_53 = arith.constant 0 : index
    %141 = vector.load %arg14[%c0_52, %c0_53] : memref<16x32xf32, #tpu.memory_space<vmem>>, vector<16x32xf32>
    tpu.vector_store %arg14[%c0_52, %c0_53], %137 {strides = array<i32>} : memref<16x32xf32, #tpu.memory_space<vmem>>, vector<16x32xf32>,
    %c1_i32_54 = arith.constant 1 : i32
    %142 = arith.cmpi eq, %arg1, %c1_i32_54 : i32
    %143 = arith.extui %142 : i1 to i32
    %c0_i32_55 = arith.constant 0 : i32
    %144 = arith.cmpi ne, %143, %c0_i32_55 : i32
    scf.if %144 {
      %145 = arith.truncf %139 : vector<16x32xf32> to vector<16x32xbf16>
      %c0_56 = arith.constant 0 : index
      %c0_57 = arith.constant 0 : index
      %146 = vector.load %arg6[%c0_56, %c0_57] : memref<32x32xbf16, #tpu.memory_space<vmem>>, vector<32x32xbf16>
      %cst_58 = arith.constant dense<0.000000e+00> : vector<16x32xf32>
      %147 = tpu.matmul %145, %146, %cst_58 {dimension_numbers = #tpu.dot_dimension_numbers<[1], [0], [0], [1], [0, 0, 1, 1], [], []>} : vector<16x32xbf16>, vector<32x32xbf16>, vector<16x32xf32> -> vector<16x32xf32>
      %148 = arith.truncf %137 : vector<16x32xf32> to vector<16x32xbf16>
      %c0_59 = arith.constant 0 : index
      %c0_60 = arith.constant 0 : index
      %149 = vector.load %arg7[%c0_59, %c0_60] : memref<32x32xbf16, #tpu.memory_space<vmem>>, vector<32x32xbf16>
      %cst_61 = arith.constant dense<0.000000e+00> : vector<16x32xf32>
      %150 = tpu.matmul %148, %149, %cst_61 {dimension_numbers = #tpu.dot_dimension_numbers<[1], [0], [0], [1], [0, 0, 1, 1], [], []>} : vector<16x32xbf16>, vector<32x32xbf16>, vector<16x32xf32> -> vector<16x32xf32>
      %151 = arith.addf %147, %150 : vector<16x32xf32>
      %c0_62 = arith.constant 0 : index
      %c0_63 = arith.constant 0 : index
      %152 = vector.load %arg8[%c0_62, %c0_63] : memref<1x32xf32, #tpu.memory_space<vmem>>, vector<1x32xf32>
      %153 = vector.broadcast %152 : vector<1x32xf32> to vector<16x32xf32>
      %154 = arith.addf %151, %153 : vector<16x32xf32>
      %155 = arith.truncf %154 : vector<16x32xf32> to vector<16x32xbf16>
      %c0_64 = arith.constant 0 : index
      %c0_65 = arith.constant 0 : index
      %156 = vector.load %arg9[%c0_64, %c0_65] : memref<32x16xbf16, #tpu.memory_space<vmem>>, vector<32x16xbf16>
      %cst_66 = arith.constant dense<0.000000e+00> : vector<16x16xf32>
      %157 = tpu.matmul %155, %156, %cst_66 {dimension_numbers = #tpu.dot_dimension_numbers<[1], [0], [0], [1], [0, 0, 1, 1], [], []>} : vector<16x32xbf16>, vector<32x16xbf16>, vector<16x16xf32> -> vector<16x16xf32>
      %c0_67 = arith.constant 0 : index
      %c0_68 = arith.constant 0 : index
      %158 = vector.load %arg10[%c0_67, %c0_68] : memref<1x16xf32, #tpu.memory_space<vmem>>, vector<1x16xf32>
      %159 = vector.broadcast %158 : vector<1x16xf32> to vector<16x16xf32>
      %160 = arith.addf %157, %159 : vector<16x16xf32>
      %c0_69 = arith.constant 0 : index
      %c0_70 = arith.constant 0 : index
      %c0_71 = arith.constant 0 : index
      %161 = vector.load %arg11[%c0_69, %c0_70, %c0_71] : memref<1x16x16xf32, #tpu.memory_space<vmem>>, vector<1x16x16xf32>
      %162 = vector.shape_cast %161 : vector<1x16x16xf32> to vector<16x16xf32>
      %163 = vector.shape_cast %160 : vector<16x16xf32> to vector<1x16x16xf32>
      tpu.vector_store %arg11[%c0_69, %c0_70, %c0_71], %163 {strides = array<i32>} : memref<1x16x16xf32, #tpu.memory_space<vmem>>, vector<1x16x16xf32>,
    } else {
    }
    return
  }
  func.func @transform_0(%arg0: i32, %arg1: i32) -> (i32, i32, i32) {
    %c0_i32 = arith.constant 0 : i32
    %c0_i32_0 = arith.constant 0 : i32
    return %arg1, %arg0, %c0_i32 : i32, i32, i32
  }
  func.func @transform_1(%arg0: i32, %arg1: i32) -> (i32, i32) {
    %c0_i32 = arith.constant 0 : i32
    %c0_i32_0 = arith.constant 0 : i32
    %c0_i32_1 = arith.constant 0 : i32
    return %c0_i32, %c0_i32_0 : i32, i32
  }
  func.func @transform_2(%arg0: i32, %arg1: i32) -> (i32, i32) {
    %c0_i32 = arith.constant 0 : i32
    %c0_i32_0 = arith.constant 0 : i32
    %c0_i32_1 = arith.constant 0 : i32
    return %c0_i32, %c0_i32_0 : i32, i32
  }
  func.func @transform_3(%arg0: i32, %arg1: i32) -> (i32, i32) {
    %c0_i32 = arith.constant 0 : i32
    %c0_i32_0 = arith.constant 0 : i32
    %c0_i32_1 = arith.constant 0 : i32
    return %c0_i32, %c0_i32_0 : i32, i32
  }
  func.func @transform_4(%arg0: i32, %arg1: i32) -> (i32, i32) {
    %c0_i32 = arith.constant 0 : i32
    %c0_i32_0 = arith.constant 0 : i32
    %c0_i32_1 = arith.constant 0 : i32
    return %c0_i32, %c0_i32_0 : i32, i32
  }
  func.func @transform_5(%arg0: i32, %arg1: i32) -> (i32, i32) {
    %c0_i32 = arith.constant 0 : i32
    %c0_i32_0 = arith.constant 0 : i32
    %c0_i32_1 = arith.constant 0 : i32
    return %c0_i32, %c0_i32_0 : i32, i32
  }
  func.func @transform_6(%arg0: i32, %arg1: i32) -> (i32, i32) {
    %c0_i32 = arith.constant 0 : i32
    %c0_i32_0 = arith.constant 0 : i32
    %c0_i32_1 = arith.constant 0 : i32
    return %c0_i32, %c0_i32_0 : i32, i32
  }
  func.func @transform_7(%arg0: i32, %arg1: i32) -> (i32, i32) {
    %c0_i32 = arith.constant 0 : i32
    %c0_i32_0 = arith.constant 0 : i32
    %c0_i32_1 = arith.constant 0 : i32
    return %c0_i32, %c0_i32_0 : i32, i32
  }
  func.func @transform_8(%arg0: i32, %arg1: i32) -> (i32, i32) {
    %c0_i32 = arith.constant 0 : i32
    %c0_i32_0 = arith.constant 0 : i32
    %c0_i32_1 = arith.constant 0 : i32
    return %c0_i32, %c0_i32_0 : i32, i32
  }
  func.func @transform_9(%arg0: i32, %arg1: i32) -> (i32, i32, i32) {
    %c0_i32 = arith.constant 0 : i32
    %c0_i32_0 = arith.constant 0 : i32
    %c0_i32_1 = arith.constant 0 : i32
    return %c0_i32, %arg0, %c0_i32_0 : i32, i32, i32
  }
}

</mosaic_0001>

<bundles_post_ra>
// kernel: tpu_custom_call.1
= control target key start
LH: loop header
LB: loop body
LE: loop exit
PB: predicated region body
PF: predicated region fallthrough
CT: control target
= control target key end

     0   :  { %s2282_s0 = inlined_call_operand.hbm [shape: bf16[8,16,16], index: 0, kind: input, shape index: {}]   ;;  %s2283_s1 = inlined_call_operand.hbm [shape: bf16[16,128], index: 1, kind: input, shape index: {}]   ;;  %s2284_s2 = inlined_call_operand.vmem [shape: bf16[32,128], index: 2, kind: input, shape index: {}]   ;;  %s2285_s3 = inlined_call_operand.vmem [shape: f32[1,128], index: 3, kind: input, shape index: {}]   ;;  %s2286_s4 = inlined_call_operand.hbm [shape: bf16[32,32], index: 4, kind: input, shape index: {}]   ;;  %s2287_s5 = inlined_call_operand.vmem [shape: bf16[32,32], index: 5, kind: input, shape index: {}]   ;;  %s2288_s6 = inlined_call_operand.vmem [shape: f32[1,32], index: 6, kind: input, shape index: {}]   ;;  %s2289_s7 = inlined_call_operand.vmem [shape: bf16[32,16], index: 7, kind: input, shape index: {}]   ;;  %s2290_s8 = inlined_call_operand.vmem [shape: f32[1,16], index: 8, kind: input, shape index: {}]   ;;  %s2291_s9 = inlined_call_operand.hbm [shape: f32[1,16,16], index: 9, kind: output, shape index: {}]  }
   0x1   :  { %2295 = sst [smem:[#allocation15_spill]] %s2283_s1 }
   0x2   :  { %2296 = sst [smem:[#allocation16_spill]] %s2286_s4 }
   0x3   :  { %14 = vsyncpa [#allocation6], 0 }
   0x4   :  { %16 = vsyncpa [#allocation6 + $0x1], 0 }
   0x5   :  { %17 = vsyncpa [#allocation9], 0 }
   0x6   :  { %18 = vsyncpa [#allocation7], 0  ;;  %s1966_s30 = smov 0   ;;  %s1968_s10 = smov 0  }
   0x7   :  { %s1970_s11 = smov 0   ;;  %s1972_s12 = smov 0  }
   0x8   :  { %s1974_s13 = smov 0   ;;  %s1976_s14 = smov 0  }
   0x9 LB: > { %s2292_s15 = sadd.s32 4294967295, %s1896_s14   ;;  %p58_p0 = scmp.ne.s32.totalorder %s1880_s10, %s1876_s30  ;;  %s1896_s14 = sphi %s1976_s14, %s24_s14   ;;  %s1892_s13 = sphi %s1974_s13, %s2312_s13   ;;  %s1888_s12 = sphi %s1972_s12, %s2311_s12   ;;  %s1884_s11 = sphi %s1970_s11, %s2310_s11   ;;  %s1880_s10 = sphi %s1968_s10, %s2309_s10   ;;  %s1876_s30 = sphi %s1966_s30, %s2308_s30  }
   0xa   : > { %p1998_p1 = scmp.eq.s32.totalorder %s2292_s15, 0  ;;  %p1390_p2 = scmp.ge.s32.totalorder %s1896_s14, 1 }
   0xb   : > { %p263_p3 = scmp.lt.s32.totalorder %s1896_s14, 3  ;;  %s1898_s19 = smov [#allocation8]  }
   0xc   : > { %p2006_p4 = por %p1998_p1, %p58_p0  ;;  %s275_s20 = sshll.u32 %s1898_s19, 4  ;;  %s276_s20 = int_to_ptr.vmem [resolvable:$true] %s275_s20 }
   0xd   : > { %p2010_p5 = pnand %p1390_p2, %p263_p3  ;;  %s1899_s22 = smov [#allocation10]  }
   0xe   : > { %s294_s23 = sshll.u32 %s1899_s22, 4  ;;  %s1745_s24 = scalar_lea.vmem %s276_s20, 128  ;;  %s295_s23 = int_to_ptr.vmem [resolvable:$true] %s294_s23 }
   0xf   : > { %p1574_p6 = pneg %p2010_p5  ;;  %p1746_p9 = scmp.ne.s32.totalorder %s276_s20, %s1745_s24 }
  0x10   : > { %p1753_p12 = scmp.lt.s32.totalorder %s276_s20, %s276_s20  ;;  %p1754_p13 = scmp.lt.s32.totalorder %s1745_s24, %s1745_s24 }
  0x11   : > { %p2018_p7 = pnand %p1574_p6, %p1998_p1 }
  0x12   : > { %p1755_p0 = por %p1754_p13, %p1753_p12 }
  0x13   : > { %p1736_p8 = pneg %p2018_p7 }
  0x15   : > { %p1748_p10 = pnand %p1746_p9, %p1736_p8 }
  0x17   : > { %p1749_p11 = pneg %p1748_p10 }
  0x19   : > { %p1756_p2 = pnand %p1755_p0, %p1749_p11 }
  0x1b   : > { %1759 = shalt.err (!%p1756_p2)
}
  0x1c   : > { %s2293_s25 = smov 64   ;;  %s2294_s26 = smov 4  }
  0x1d   : > { %s2301_s1 = sld [smem:[#allocation15_spill]]  ;;  %s1771_s29 = scalar_lea.vmem %s295_s23, 256 }
  0x1e   : > { %p1772_p3 = scmp.ne.s32.totalorder %s295_s23, %s1771_s29  ;;  %p1779_p10 = scmp.lt.s32.totalorder %s295_s23, %s295_s23 }
  0x1f   : > { %p1780_p11 = scmp.lt.s32.totalorder %s1771_s29, %s1771_s29 }
  0x20   : > { %p1774_p6 = pnand %p1772_p3, %p1736_p8 }
  0x21   : > { %p1781_p12 = por %p1780_p11, %p1779_p10 }
  0x22   : > { %p1775_p9 = pneg %p1774_p6 }
  0x23   : > { %1577 = dma.hbm_to_vmem [thread:$0]  (!%p2018_p7), %s2301_s1, 128, %s276_s20, [#allocation9], %s2293_s25, %s2293_s25, %s2294_s26  }
  0x24   : > { %p1782_p13 = pnand %p1781_p12, %p1775_p9 }
  0x26   : > { %1785 = shalt.err (!%p1782_p13)
}
  0x27   : > { %s2302_s4 = sld [smem:[#allocation16_spill]]  ;;  %s33_s20 = sadd.s32 1, %s1892_s13 }
  0x28   : > { %s45_s22 = sadd.s32 1, %s1884_s11  ;;  %p34_p8 = scmp.ge.s32.totalorder %s33_s20, 2 }
  0x29   : > { %p52_p0 = scmp.ne.s32.totalorder %s1884_s11, %s1880_s10  ;;  %p53_p2 = scmp.eq.s32.totalorder %s1896_s14, 0 }
  0x2a   : > { %p1587_p3 = scmp.lt.s32.totalorder %s1896_s14, 2  ;;  %s2314_s20 = smov (%p34_p8, %s33_s20), 0 }
  0x2b   : > { %p54_p6 = por %p53_p2, %p52_p0  ;;  %s320_s21 = sand.u32 1, %s1884_s11  }
  0x2c   : > { %s40_s24 = ssub.s32 %s1892_s13, %s2314_s20  ;;  %s1394_s27 = sshll.u32 %s320_s21, 5 }
  0x2d   : > { %1580 = dma.hbm_to_vmem [thread:$0]  (!%p2018_p7), %s2302_s4, 256, %s295_s23, [#allocation9], %s2293_s25, %s2293_s25, %s2294_s26  }
  0x2e   : > { %p43_p9 = scmp.eq.s32.totalorder %s40_s24, 0  ;;  %s1450_s28 = sshll.u32 %s1892_s13, 9 }
  0x2f   : > { %s333_s19 = scalar_lea.hbm %s2282_s0, %s1450_s28  ;;  %s324_s15 = scalar_lea.vmem [#allocation5], %s1394_s27 }
  0x30   : > { %s2059_s29 = scalar_select %p43_p9, %s1884_s11, %s45_s22  }
  0x31   : > { %s334_s25 = sshll.u32 %s324_s15, 4  ;;  %p2066_p7 = pnand %p1587_p3, %p54_p6  ;;  %s335_s25 = int_to_ptr.vmem [resolvable:$true] %s334_s25 }
  0x32   : > { %s321_s1 = scalar_lea.sflag [#allocation6], %s320_s21  ;;  %s1799_s24 = scalar_lea.vmem %s335_s25, 512 }
  0x33   : > { %p1788_p10 = pneg %p2066_p7  ;;  %p1800_p11 = scmp.ne.s32.totalorder %s335_s25, %s1799_s24 }
  0x34   : > { %s1902_s22 = smov [#allocation5]  }
  0x35   : > { %p1802_p12 = pnand %p1800_p11, %p1788_p10  ;;  %s1804_s4 = sshll.u32 %s1902_s22, 4  ;;  %s1805_s4 = int_to_ptr.vmem [resolvable:$false] %s1804_s4 }
  0x36   : > { %s1806_s28 = scalar_lea.vmem %s1805_s4, 1024  ;;  %p1807_p8 = scmp.lt.s32.totalorder %s335_s25, %s1805_s4 }
  0x37   : > { %p1803_p13 = pneg %p1802_p12  ;;  %p1808_p0 = scmp.lt.s32.totalorder %s1806_s28, %s1799_s24 }
  0x39   : > { %p1809_p2 = por %p1808_p0, %p1807_p8 }
  0x3b   : > { %p1810_p9 = pnand %p1809_p2, %p1803_p13 }
  0x3d   : > { %1813 = shalt.err (!%p1810_p9)
}
  0x3e   : > { %s2304_s15 = smov 4   ;;  %s2305_s27 = smov 64  }
  0x3f   : > { %1584 = dma.hbm_to_vmem [thread:$0]  (!%p2066_p7), %s333_s19, 512, %s335_s25, %s321_s1, %s2305_s27, %s2305_s27, %s2304_s15  }
  0x40   : > { %346 = sbr.rel (%p2010_p5) target bundleno = 3426 (0xd62), region = 56  ;;  %s348_s21 = sand.u32 (!%p2010_p5), 1, %s1880_s10  }
  0x41   : > { %s1399_s30 = sshll.u32 (!%p2010_p5), %s348_s21, 5  ;;  %s349_s23 = scalar_lea.sflag (!%p2010_p5), [#allocation6], %s348_s21 }
  0x42   : > { %s2080_s22 = scalar_lea.vmem (!%p2010_p5), [#allocation5], %s1399_s30 }
  0x45   : > { %1863 = dma.done.wait (%p2006_p4), %s349_s23, 512  }
  0x46   : > { %1865 = vsyncadd (%p2006_p4), %s349_s23, 4294966784 }
  0x47   : > { %1867 = dma.done.wait (%p1998_p1), [#allocation9], 384  }
  0x48   : > { %1869 = vsyncadd (%p1998_p1), [#allocation9], 4294966912  ;;  %p1402_p5 = scmp.ne.s32.totalorder %s1888_s12, 0 }
  0x4a   : > { %397 = sbr.rel (%p1402_p5) target bundleno = 82 (0x52), region = 72 }
  0x4f   : > { %vm398_vm0 = vcmask 261120   ;;  %v1903_v0 = vmov 0.0  }
  0x50   : > { %399 = vst.msk [vmem:[#allocation3] sm:$0xff] %vm398_vm0, %v1903_v0  ;;  %400 = vst.msk [vmem:[#allocation3 + $0x8] sm:$0xff] %vm398_vm0, %v1903_v0 }
  0x51   : > { %401 = vst.msk [vmem:[#allocation4] sm:$0xff] %vm398_vm0, %v1903_v0  ;;  %402 = vst.msk [vmem:[#allocation4 + $0x8] sm:$0xff] %vm398_vm0, %v1903_v0 }
  0x52 PF: > { %v2091_v1 = vld [vmem:[#allocation8] sm:$0xff]   ;;  %v1904_v2 = vmov 0.0   ;;  %vm1905_vm1 = vmmov 0   ;;  %vm425_vm2 = vcmask 130048   ;;  %s1906_s1 = smov 32   ;;  %v1659_v6 = vld [vmem:[%s2080_s22 + $0x10] sm:$0xff]  }
  0x53   : > { %1480 = vmatprep.subr.bf16.mxu0 %v1904_v2  ;;  %v1658_v3 = vld [vmem:[%s2080_s22] sm:$0xff]   ;;  %1486 = vmatprep.subr.bf16.mxu1 %v1904_v2  ;;  %v2114_v7 = vld [vmem:[%s2284_s2 + $0x8] sm:$0xff]   ;;  %vm660_vm3 = vcmask 261120   ;;  %v1663_v53 = vld [vmem:[%s2080_s22 + $0x18] sm:$0xff]   ;;  %s1907_s19 = smov 64   ;;  %s1908_s24 = smov 96  }
  0x54   : > { %1481 = vmatpush3.bf16.msra.mxu0 %v2091_v1  ;;  %1482 = vmatprep.mubr.msk.bf16.mxu0 %vm1905_vm1, %v1904_v2  ;;  %v2122_v8 = vld [vmem:[%s2284_s2] sm:$0xff]   ;;  %v1662_v51 = vld [vmem:[%s2080_s22 + $0x8] sm:$0xff]   ;;  %p1433_p1 = scmp.ne.s32.totalorder %s1888_s12, 1 }
  0x55   : > { %1492 = vmatprep.subr.bf16.mxu0 %v1904_v2  ;;  %1487 = vmatpush3.bf16.msra.mxu1 %v2091_v1  ;;  %v2140_v18 = vld [vmem:[%s2285_s3] ss:$0 sm:$0xff]  ;;  %s1910_s27 = smov (!%p1433_p1), 96   ;;  %s1912_s12 = smov (!%p1433_p1), 64  }
  0x56   : > { %1488 = vmatprep.mubr.msk.bf16.mxu1 %vm1905_vm1, %v1904_v2  ;;  %1498 = vmatprep.subr.bf16.mxu1 %v1904_v2 }
  0x57   : > { %1483 = vmatmul.mubr.msk.bf16.vlgmr.msra.gmra.mxu0 %vm425_vm2, %v1658_v3  ;;  %v641_v9 = vld [vmem:[#allocation3] sm:$0xff]  ;;  %v642_v10 = vld [vmem:[#allocation3 + $0x8] sm:$0xff] }
  0x58   : > { %v643_v4 = vld [vmem:[#allocation4] sm:$0xff]  ;;  %1493 = vmatpush3.bf16.msra.mxu0 %v2091_v1  ;;  %1494 = vmatprep.mubr.msk.bf16.mxu0 %vm1905_vm1, %v1904_v2  ;;  %v644_v5 = vld [vmem:[#allocation4 + $0x8] sm:$0xff]  ;;  %v647_v11 = vpack.c.bf16 %v642_v10, %v641_v9 }
  0x59   : > { %1504 = vmatprep.subr.bf16.mxu0 %v1904_v2  ;;  %723 = vrot.lane.b32.xlu1 %v643_v4, %s1906_s1 }
  0x5a   : > { %1489 = vmatmul.mubr.msk.bf16.vlgmr.msra.gmra.mxu1 %vm425_vm2, %v1662_v51 }
  0x5b   : > { %1499 = vmatpush3.bf16.msra.mxu1 %v2091_v1  ;;  %1500 = vmatprep.mubr.msk.bf16.mxu1 %vm1905_vm1, %v1904_v2 }
  0x5c   : > { %1512 = vmatprep.subr.bf16.mxu1 %v1904_v2 }
  0x5d   : > { %725 = vrot.lane.b32.xlu1 %v644_v5, %s1906_s1 }
  0x5f   : > { %1495 = vmatmul.mubr.msk.bf16.vlgmr.msra.gmra.mxu0 %vm425_vm2, %v1659_v6 }
  0x60   : > { %1505 = vmatpush3.bf16.msra.mxu0 %v2114_v7  ;;  %1508 = vmatprep.mubr.msk.bf16.mxu0 %vm1905_vm1, %v1904_v2 }
  0x61   : > { %1506 = vmatprep.subr.bf16.mxu0 %v1904_v2 }
  0x62   : > { %1501 = vmatmul.mubr.msk.bf16.vlgmr.msra.gmra.mxu1 %vm425_vm2, %v1663_v53 }
  0x63   : > { %1513 = vmatpush3.bf16.msra.mxu1 %v2114_v7  ;;  %1516 = vmatprep.mubr.msk.bf16.mxu1 %vm1905_vm1, %v1904_v2 }
  0x64   : > { %1507 = vmatpush3.bf16.msra.mxu0 %v2122_v8  ;;  %1514 = vmatprep.subr.bf16.mxu1 %v1904_v2 }
  0x65   : > { %1520 = vmatprep.subr.bf16.mxu0 %v1904_v2 }
  0x67   : > { %1509 = vmatmul.mubr.msk.bf16.vlgmr.msra.gmra.mxu0 %vm660_vm3, %v647_v11  ;;  %1515 = vmatpush3.bf16.msra.mxu1 %v2122_v8 }
  0x68   : > { %1521 = vmatpush3.bf16.msra.mxu0 %v2114_v7  ;;  %1524 = vmatprep.mubr.msk.bf16.mxu0 %vm1905_vm1, %v1904_v2 }
  0x69   : > { %1522 = vmatprep.subr.bf16.mxu0 %v1904_v2  ;;  %1528 = vmatprep.subr.bf16.mxu1 %v1904_v2 }
  0x6c   : > { %1523 = vmatpush3.bf16.msra.mxu0 %v2122_v8 }
  0xcb   : > { %v724_v43 = vpop.permute.xlu1 %723 }
  0xcf   : > { %v726_v45 = vpop.permute.xlu1 %725 }
 0x117   : > { %v463_v12 = vpop.f32.mrf.mxu0 }
 0x118   : > { %v464_v21 = vadd.f32 %v2140_v18, %v463_v12 }
 0x119   : > { %v1484_v13 = vpop.f32.mrf.mxu0 }
 0x11a   : > { %v517_v60 = vpop.f32.mrf.mxu1 }
 0x11b   : > { %v466_v14 = vpop.f32.mrf.mxu0  ;;  %v518_v6 = vadd.f32 %v2140_v18, %v517_v60 }
 0x11c   : > { %v467_v25 = vadd.f32 %v2140_v18, %v466_v14  ;;  %v1490_v61 = vpop.f32.mrf.mxu1 }
 0x11d   : > { %v1485_v15 = vpop.f32.mrf.mxu0 }
 0x11e   : > { %v520_v62 = vpop.f32.mrf.mxu1 }
 0x11f   : > { %v2135_v16 = vpop.f32.mrf.mxu0  ;;  %v521_v12 = vadd.f32 %v2140_v18, %v520_v62 }
 0x120   : > { %v1491_v63 = vpop.f32.mrf.mxu1 }
 0x121   : > { %v1496_v17 = vpop.f32.mrf.mxu0 }
 0x122   : > { %v2173_v0 = vpop.f32.mrf.mxu1 }
 0x123   : > { %v2142_v19 = vpop.f32.mrf.mxu0 }
 0x124   : > { %v1502_v1 = vpop.f32.mrf.mxu1 }
 0x125   : > { %v1497_v20 = vpop.f32.mrf.mxu0 }
 0x126   : > { %v2175_v3 = vpop.f32.mrf.mxu1 }
 0x127   : > { %v698_v22 = vpop.f32.mrf.mxu0 }
 0x128   : > { %v705_v23 = vadd.f32 %v698_v22, %v464_v21  ;;  %v1503_v4 = vpop.f32.mrf.mxu1 }
 0x129   : > { %v1510_v24 = vpop.f32.mrf.mxu0 }
 0x12a   : > { %1664 = vtanh.f32 %v705_v23  ;;  %v1422_v31 = vmul.f32 -1.442695, %v705_v23 }
 0x12b   : > { %v701_v26 = vpop.f32.mrf.mxu0 }
 0x12c   : > { %v706_v27 = vadd.f32 %v701_v26, %v467_v25 }
 0x12d   : > { %v1511_v28 = vpop.f32.mrf.mxu0 }
 0x12e   : > { %1666 = vtanh.f32 %v706_v27  ;;  %v1423_v32 = vmul.f32 -1.442695, %v706_v27 }
 0x12f   : > { %1668 = vpow2.f32 %v1422_v31 }
 0x130   : > { %1670 = vpow2.f32 %v1423_v32 }
 0x137   : > { %v1665_v29 = vpop.eup %1664 }
 0x138   : > { %733 = vrot.lane.b32.xlu0 %v1665_v29, %s1906_s1 }
 0x13b   : > { %v1667_v30 = vpop.eup %1666 }
 0x13c   : > { %735 = vrot.lane.b32.xlu0 %v1667_v30, %s1906_s1  ;;  %v1669_v33 = vpop.eup %1668 }
 0x13d   : > { %v713_v34 = vadd.f32 1.0, %v1669_v33  ;;  %v1671_v35 = vpop.eup %1670 }
 0x13e   : > { %v714_v36 = vadd.f32 1.0, %v1671_v35 }
 0x13f   : > { %1672 = vrcp.f32 %v713_v34 }
 0x140   : > { %1674 = vrcp.f32 %v714_v36 }
 0x14c   : > { %v1673_v37 = vpop.eup %1672 }
 0x14d   : > { %v1675_v40 = vpop.eup %1674  ;;  %v729_v44 = vmul.f32 %v1673_v37, %v724_v43 }
 0x14e   : > { %v730_v48 = vmul.f32 %v1675_v40, %v726_v45 }
 0x1aa   : > { %v734_v38 = vpop.permute.xlu0 %733 }
 0x1ab   : > { %v739_v39 = vmul.f32 %v1673_v37, %v734_v38 }
 0x1ad   : > { %743 = vrot.lane.b32.xlu0 %v739_v39, %s1906_s1 }
 0x1ae   : > { %v736_v41 = vpop.permute.xlu0 %735 }
 0x1af   : > { %v740_v42 = vmul.f32 %v1675_v40, %v736_v41 }
 0x1b1   : > { %745 = vrot.lane.b32.xlu1 %v740_v42, %s1906_s1 }
 0x21f   : > { %v744_v46 = vpop.permute.xlu0 %743 }
 0x220   : > { %v2150_v47 = vadd.f32 %v744_v46, %v729_v44  ;;  %v573_v44 = vadd.f32 %v2140_v18, %v2135_v16 }
 0x222   : > { %1676 = vtanh.f32 %v2150_v47 }
 0x223   : > { %v746_v49 = vpop.permute.xlu1 %745 }
 0x224   : > { %v2153_v50 = vadd.f32 %v746_v49, %v730_v48  ;;  %v576_v48 = vadd.f32 %v2140_v18, %v2142_v19 }
 0x226   : > { %1678 = vtanh.f32 %v2153_v50 }
 0x22f   : > { %v1677_v52 = vpop.eup %1676 }
 0x230   : > { %755 = vrot.lane.b32.xlu0 %v1677_v52, %s1906_s1 }
 0x233   : > { %v1679_v54 = vpop.eup %1678 }
 0x234   : > { %757 = vrot.lane.b32.xlu1 %v1679_v54, %s1906_s1 }
 0x2a2   : > { %v756_v55 = vpop.permute.xlu0 %755 }
 0x2a3   : > { %v761_v57 = vmul.f32 %v1673_v37, %v756_v55 }
 0x2a6   : > { %v758_v56 = vpop.permute.xlu1 %757 }
 0x2a7   : > { %v762_v58 = vmul.f32 %v1675_v40, %v758_v56 }
 0x2a9   : > { %v765_v59 = vpack.c.bf16 %v762_v58, %v761_v57 }
 0x2ab   : > { %767 = vrot.lane.b32.xlu0 %v765_v59, %s1907_s19 }
 0x31d   : > { %v768_v5 = vpop.permute.xlu0 %767 }
 0x31e   : > { %1517 = vmatmul.mubr.msk.bf16.vlgmr.msra.gmra.mxu1 %vm660_vm3, %v768_v5 }
 0x31f   : > { %1529 = vmatpush3.bf16.msra.mxu1 %v2114_v7  ;;  %1532 = vmatprep.mubr.msk.bf16.mxu1 %vm1905_vm1, %v1904_v2 }
 0x320   : > { %1530 = vmatprep.subr.bf16.mxu1 %v1904_v2 }
 0x323   : > { %1531 = vmatpush3.bf16.msra.mxu1 %v2122_v8 }
 0x3de   : > { %v806_v9 = vpop.f32.mrf.mxu1 }
 0x3df   : > { %v813_v10 = vadd.f32 %v806_v9, %v518_v6 }
 0x3e0   : > { %v1518_v11 = vpop.f32.mrf.mxu1 }
 0x3e1   : > { %1680 = vtanh.f32 %v813_v10  ;;  %v1425_v2 = vmul.f32 -1.442695, %v813_v10 }
 0x3e2   : > { %v809_v13 = vpop.f32.mrf.mxu1 }
 0x3e3   : > { %v814_v14 = vadd.f32 %v809_v13, %v521_v12 }
 0x3e4   : > { %v1519_v15 = vpop.f32.mrf.mxu1 }
 0x3e5   : > { %1682 = vtanh.f32 %v814_v14  ;;  %v1426_v8 = vmul.f32 -1.442695, %v814_v14 }
 0x3e6   : > { %1684 = vpow2.f32 %v1425_v2 }
 0x3e7   : > { %1686 = vpow2.f32 %v1426_v8  ;;  %v628_v8 = vadd.f32 %v2140_v18, %v2173_v0 }
 0x3ee   : > { %v1681_v7 = vpop.eup %1680 }
 0x3ef   : > { %833 = vrot.lane.b32.xlu1 %v1681_v7, %s1906_s1 }
 0x3f2   : > { %v1683_v17 = vpop.eup %1682 }
 0x3f3   : > { %835 = vrot.lane.b32.xlu0 %v1683_v17, %s1906_s1  ;;  %v1685_v20 = vpop.eup %1684 }
 0x3f4   : > { %v821_v21 = vadd.f32 1.0, %v1685_v20  ;;  %v1687_v22 = vpop.eup %1686 }
 0x3f5   : > { %v822_v23 = vadd.f32 1.0, %v1687_v22 }
 0x3f6   : > { %1688 = vrcp.f32 %v821_v21 }
 0x3f7   : > { %1690 = vrcp.f32 %v822_v23  ;;  %v631_v23 = vadd.f32 %v2140_v18, %v2175_v3 }
 0x403   : > { %v1689_v24 = vpop.eup %1688 }
 0x404   : > { %v1691_v27 = vpop.eup %1690  ;;  %v829_v30 = vmul.f32 %v1689_v24, %v2150_v47 }
 0x405   : > { %v830_v33 = vmul.f32 %v1691_v27, %v2153_v50 }
 0x461   : > { %v834_v25 = vpop.permute.xlu1 %833 }
 0x462   : > { %v839_v26 = vmul.f32 %v1689_v24, %v834_v25 }
 0x464   : > { %843 = vrot.lane.b32.xlu1 %v839_v26, %s1906_s1 }
 0x465   : > { %v836_v28 = vpop.permute.xlu0 %835 }
 0x466   : > { %v840_v29 = vmul.f32 %v1691_v27, %v836_v28 }
 0x468   : > { %845 = vrot.lane.b32.xlu0 %v840_v29, %s1906_s1 }
 0x4d6   : > { %v844_v31 = vpop.permute.xlu1 %843 }
 0x4d7   : > { %v849_v32 = vadd.f32 %v844_v31, %v829_v30 }
 0x4d9   : > { %1692 = vtanh.f32 %v849_v32 }
 0x4da   : > { %v846_v34 = vpop.permute.xlu0 %845 }
 0x4db   : > { %v850_v35 = vadd.f32 %v846_v34, %v830_v33 }
 0x4dd   : > { %1694 = vtanh.f32 %v850_v35 }
 0x4e6   : > { %v1693_v36 = vpop.eup %1692 }
 0x4e7   : > { %855 = vrot.lane.b32.xlu1 %v1693_v36, %s1906_s1 }
 0x4ea   : > { %v1695_v37 = vpop.eup %1694 }
 0x4eb   : > { %857 = vrot.lane.b32.xlu0 %v1695_v37, %s1906_s1 }
 0x559   : > { %v856_v38 = vpop.permute.xlu1 %855 }
 0x55a   : > { %v861_v40 = vmul.f32 %v1689_v24, %v856_v38 }
 0x55d   : > { %v858_v39 = vpop.permute.xlu0 %857 }
 0x55e   : > { %v862_v41 = vmul.f32 %v1691_v27, %v858_v39 }
 0x560   : > { %v865_v42 = vpack.c.bf16 %v862_v41, %v861_v40 }
 0x562   : > { %867 = vrot.lane.b32.xlu1 %v865_v42, %s1907_s19 }
 0x5d4   : > { %v868_v43 = vpop.permute.xlu1 %867 }
 0x5d5   : > { %1525 = vmatmul.mubr.msk.bf16.vlgmr.msra.gmra.mxu0 %vm660_vm3, %v868_v43 }
 0x695   : > { %v906_v45 = vpop.f32.mrf.mxu0 }
 0x696   : > { %v913_v46 = vadd.f32 %v906_v45, %v573_v44 }
 0x697   : > { %v1526_v47 = vpop.f32.mrf.mxu0 }
 0x698   : > { %1696 = vtanh.f32 %v913_v46  ;;  %v1428_v54 = vmul.f32 -1.442695, %v913_v46 }
 0x699   : > { %v909_v49 = vpop.f32.mrf.mxu0 }
 0x69a   : > { %v914_v50 = vadd.f32 %v909_v49, %v576_v48 }
 0x69b   : > { %v1527_v51 = vpop.f32.mrf.mxu0 }
 0x69c   : > { %1698 = vtanh.f32 %v914_v50  ;;  %v1429_v16 = vmul.f32 -1.442695, %v914_v50 }
 0x69d   : > { %1700 = vpow2.f32 %v1428_v54 }
 0x69e   : > { %1702 = vpow2.f32 %v1429_v16 }
 0x6a5   : > { %v1697_v52 = vpop.eup %1696 }
 0x6a6   : > { %933 = vrot.lane.b32.xlu0 %v1697_v52, %s1906_s1 }
 0x6a9   : > { %v1699_v53 = vpop.eup %1698 }
 0x6aa   : > { %935 = vrot.lane.b32.xlu1 %v1699_v53, %s1906_s1  ;;  %v1701_v55 = vpop.eup %1700 }
 0x6ab   : > { %v921_v56 = vadd.f32 1.0, %v1701_v55  ;;  %v1703_v57 = vpop.eup %1702 }
 0x6ac   : > { %v922_v19 = vadd.f32 1.0, %v1703_v57 }
 0x6ad   : > { %1704 = vrcp.f32 %v921_v56 }
 0x6ae   : > { %1706 = vrcp.f32 %v922_v19 }
 0x6ba   : > { %v1705_v58 = vpop.eup %1704 }
 0x6bb   : > { %v1707_v61 = vpop.eup %1706  ;;  %v929_v1 = vmul.f32 %v1705_v58, %v849_v32 }
 0x6bc   : > { %v930_v6 = vmul.f32 %v1707_v61, %v850_v35 }
 0x718   : > { %v934_v59 = vpop.permute.xlu0 %933 }
 0x719   : > { %v939_v60 = vmul.f32 %v1705_v58, %v934_v59 }
 0x71b   : > { %943 = vrot.lane.b32.xlu0 %v939_v60, %s1906_s1 }
 0x71c   : > { %v936_v62 = vpop.permute.xlu1 %935 }
 0x71d   : > { %v940_v63 = vmul.f32 %v1707_v61, %v936_v62 }
 0x71f   : > { %945 = vrot.lane.b32.xlu1 %v940_v63, %s1906_s1 }
 0x78d   : > { %v944_v4 = vpop.permute.xlu0 %943 }
 0x78e   : > { %v949_v5 = vadd.f32 %v944_v4, %v929_v1 }
 0x790   : > { %1708 = vtanh.f32 %v949_v5 }
 0x791   : > { %v946_v9 = vpop.permute.xlu1 %945 }
 0x792   : > { %v950_v10 = vadd.f32 %v946_v9, %v930_v6 }
 0x794   : > { %1710 = vtanh.f32 %v950_v10 }
 0x79d   : > { %v1709_v11 = vpop.eup %1708 }
 0x79e   : > { %955 = vrot.lane.b32.xlu0 %v1709_v11, %s1906_s1 }
 0x7a1   : > { %v1711_v12 = vpop.eup %1710 }
 0x7a2   : > { %957 = vrot.lane.b32.xlu1 %v1711_v12, %s1906_s1 }
 0x810   : > { %v956_v13 = vpop.permute.xlu0 %955 }
 0x811   : > { %v961_v15 = vmul.f32 %v1705_v58, %v956_v13 }
 0x814   : > { %v958_v14 = vpop.permute.xlu1 %957 }
 0x815   : > { %v962_v7 = vmul.f32 %v1707_v61, %v958_v14 }
 0x817   : > { %v965_v17 = vpack.c.bf16 %v962_v7, %v961_v15 }
 0x819   : > { %967 = vrot.lane.b32.xlu0 %v965_v17, %s1907_s19 }
 0x88b   : > { %v968_v2 = vpop.permute.xlu0 %967 }
 0x88c   : > { %1533 = vmatmul.mubr.msk.bf16.vlgmr.msra.gmra.mxu1 %vm660_vm3, %v968_v2 }
 0x94c   : > { %v1006_v20 = vpop.f32.mrf.mxu1 }
 0x94d   : > { %v1013_v21 = vadd.f32 %v1006_v20, %v628_v8 }
 0x94e   : > { %v1534_v22 = vpop.f32.mrf.mxu1 }
 0x94f   : > { %1712 = vtanh.f32 %v1013_v21  ;;  %v1431_v29 = vmul.f32 -1.442695, %v1013_v21 }
 0x950   : > { %v1009_v24 = vpop.f32.mrf.mxu1 }
 0x951   : > { %v1014_v25 = vadd.f32 %v1009_v24, %v631_v23 }
 0x952   : > { %v1535_v26 = vpop.f32.mrf.mxu1 }
 0x953   : > { %1714 = vtanh.f32 %v1014_v25  ;;  %v1432_v0 = vmul.f32 -1.442695, %v1014_v25 }
 0x954   : > { %1716 = vpow2.f32 %v1431_v29 }
 0x955   : > { %1718 = vpow2.f32 %v1432_v0 }
 0x95c   : > { %v1713_v27 = vpop.eup %1712 }
 0x95d   : > { %1033 = vrot.lane.b32.xlu1 %v1713_v27, %s1906_s1 }
 0x960   : > { %v1715_v28 = vpop.eup %1714 }
 0x961   : > { %1035 = vrot.lane.b32.xlu0 %v1715_v28, %s1906_s1  ;;  %v1717_v30 = vpop.eup %1716 }
 0x962   : > { %v1021_v31 = vadd.f32 1.0, %v1717_v30  ;;  %v1719_v32 = vpop.eup %1718 }
 0x963   : > { %v1022_v18 = vadd.f32 1.0, %v1719_v32 }
 0x964   : > { %1720 = vrcp.f32 %v1021_v31 }
 0x965   : > { %1722 = vrcp.f32 %v1022_v18 }
 0x971   : > { %v1721_v3 = vpop.eup %1720 }
 0x972   : > { %v1723_v35 = vpop.eup %1722  ;;  %v1029_v38 = vmul.f32 %v1721_v3, %v949_v5 }
 0x973   : > { %v1030_v41 = vmul.f32 %v1723_v35, %v950_v10 }
 0x9cf   : > { %v1034_v33 = vpop.permute.xlu1 %1033 }
 0x9d0   : > { %v1039_v34 = vmul.f32 %v1721_v3, %v1034_v33 }
 0x9d2   : > { %1043 = vrot.lane.b32.xlu1 %v1039_v34, %s1906_s1 }
 0x9d3   : > { %v1036_v36 = vpop.permute.xlu0 %1035 }
 0x9d4   : > { %v1040_v37 = vmul.f32 %v1723_v35, %v1036_v36 }
 0x9d6   : > { %1045 = vrot.lane.b32.xlu0 %v1040_v37, %s1906_s1 }
 0xa44   : > { %v1044_v39 = vpop.permute.xlu1 %1043 }
 0xa45   : > { %v1049_v40 = vadd.f32 %v1044_v39, %v1029_v38 }
 0xa47   : > { %1724 = vtanh.f32 %v1049_v40 }
 0xa48   : > { %v1046_v42 = vpop.permute.xlu0 %1045 }
 0xa49   : > { %v1050_v43 = vadd.f32 %v1046_v42, %v1030_v41 }
 0xa4b   : > { %1726 = vtanh.f32 %v1050_v43 }
 0xa54   : > { %v1725_v44 = vpop.eup %1724 }
 0xa55   : > { %1055 = vrot.lane.b32.xlu1 %v1725_v44, %s1906_s1 }
 0xa58   : > { %v1727_v45 = vpop.eup %1726 }
 0xa59   : > { %1057 = vrot.lane.b32.xlu0 %v1727_v45, %s1906_s1 }
 0xac7   : > { %v1056_v46 = vpop.permute.xlu1 %1055 }
 0xac8   : > { %v1061_v47 = vmul.f32 %v1721_v3, %v1056_v46 }
 0xaca   : > { %1065 = vrot.lane.b32.xlu1 %v1061_v47, %s1907_s19 }
 0xacb   : > { %v1058_v48 = vpop.permute.xlu0 %1057 }
 0xacc   : > { %v1062_v49 = vmul.f32 %v1723_v35, %v1058_v48 }
 0xace   : > { %1075 = vrot.lane.b32.xlu1 %v1049_v40, %s1908_s24  ;;  %1067 = vrot.lane.b32.xlu0 %v1062_v49, %s1907_s19 }
 0xad2   : > { %1077 = vrot.lane.b32.xlu0 %v1050_v43, %s1908_s24 }
 0xb3c   : > { %v1066_v50 = vpop.permute.xlu1 %1065 }
 0xb3d   : > { %1071 = vst.msk [vmem:[#allocation3] sm:$0xff] %vm660_vm3, %v1066_v50 }
 0xb40   : > { %v1076_v51 = vpop.permute.xlu1 %1075  ;;  %v1068_v52 = vpop.permute.xlu0 %1067 }
 0xb41   : > { %1081 = vst.msk [vmem:[#allocation4] sm:$0xff] %vm660_vm3, %v1076_v51  ;;  %1072 = vst.msk [vmem:[#allocation3 + $0x8] sm:$0xff] %vm660_vm3, %v1068_v52  ;;  %1086 = sbr.rel (%p1433_p1) target bundleno = 3410 (0xd52), region = 76 }
 0xb44   : > { %v1078_v53 = vpop.permute.xlu0 %1077 }
 0xb45   : > { %1082 = vst.msk [vmem:[#allocation4 + $0x8] sm:$0xff] %vm660_vm3, %v1078_v53 }
 0xb46   : > { %v1092_v54 = vpack.c.bf16 %v1050_v43, %v1049_v40  ;;  %v1728_v16 = vld [vmem:[%s2287_s5 + $0x8] sm:$0xff]   ;;  %v1909_v55 = vmov 0.0   ;;  %v1087_v56 = vpack.c.bf16 %v1062_v49, %v1061_v47  ;;  %v1729_v57 = vld [vmem:[%s2287_s5] sm:$0xff]   ;;  %v1730_v19 = vld [vmem:[#allocation10 + $0x8] sm:$0xff]   ;;  %vm1911_vm4 = vmmov 0  }
 0xb47   : > { %1536 = vmatprep.subr.bf16.mxu0 %v1909_v55  ;;  %1544 = vmatprep.subr.bf16.mxu1 %v1909_v55  ;;  %v1731_v58 = vld [vmem:[#allocation10] sm:$0xff]   ;;  %v1733_v62 = vld [vmem:[%s2289_s7] sm:$0xff]  }
 0xb48   : > { %1098 = vrot.lane.b32.xlu0 %v1092_v54, %s1910_s27  ;;  %1537 = vmatpush3.bf16.msra.mxu0 %v1728_v16  ;;  %v1732_v61 = vld [vmem:[%s2289_s7 + $0x8] sm:$0xff]   ;;  %v1440_v11 = vld [vmem:[%s2288_s6] ss:$0 sm:$0xff] }
 0xb49   : > { %1538 = vmatprep.subr.bf16.mxu0 %v1909_v55  ;;  %1540 = vmatprep.mubr.msk.bf16.mxu0 %vm1911_vm4, %v1909_v55  ;;  %v1441_v2 = vld [vmem:[%s2290_s8] ss:$0 sm:$0xff] }
 0xb4a   : > { %1548 = vmatprep.mubr.msk.bf16.mxu1 %vm1911_vm4, %v1909_v55  ;;  %1545 = vmatpush3.bf16.msra.mxu1 %v1730_v19 }
 0xb4b   : > { %1546 = vmatprep.subr.bf16.mxu1 %v1909_v55 }
 0xb4c   : > { %1157 = vrot.lane.b32.xlu0 %v1087_v56, %s1912_s12  ;;  %1539 = vmatpush3.bf16.msra.mxu0 %v1729_v57 }
 0xb4d   : > { %1552 = vmatprep.subr.bf16.mxu0 %v1909_v55 }
 0xb4e   : > { %1547 = vmatpush3.bf16.msra.mxu1 %v1731_v58 }
 0xbba   : > { %v1099_v59 = vpop.permute.xlu0 %1098 }
 0xbbb   : > { %1541 = vmatmul.mubr.msk.bf16.vlgmr.msra.gmra.mxu0 %vm660_vm3, %v1099_v59 }
 0xbbc   : > { %1556 = vmatprep.mubr.msk.bf16.mxu0 %vm1911_vm4, %v1909_v55  ;;  %1553 = vmatpush3.bf16.msra.mxu0 %v1732_v61 }
 0xbbd   : > { %1554 = vmatprep.subr.bf16.mxu0 %v1909_v55 }
 0xbbe   : > { %v1158_v60 = vpop.permute.xlu0 %1157 }
 0xbbf   : > { %1549 = vmatmul.mubr.msk.bf16.vlgmr.msra.gmra.mxu1 %vm660_vm3, %v1158_v60 }
 0xbc0   : > { %1555 = vmatpush3.bf16.msra.mxu0 %v1733_v62 }
 0xc7b   : > { %v1149_v63 = vpop.f32.mrf.mxu0 }
 0xc7d   : > { %v1542_v1 = vpop.f32.mrf.mxu0 }
 0xc7f   : > { %v1152_v4 = vpop.f32.mrf.mxu0  ;;  %v1208_v5 = vpop.f32.mrf.mxu1 }
 0xc80   : > { %v1209_v10 = vadd.f32 %v1208_v5, %v1149_v63 }
 0xc81   : > { %v1543_v6 = vpop.f32.mrf.mxu0  ;;  %v1550_v9 = vpop.f32.mrf.mxu1 }
 0xc82   : > { %v1222_v15 = vadd.f32 %v1440_v11, %v1209_v10 }
 0xc83   : > { %v1211_v12 = vpop.f32.mrf.mxu1 }
 0xc84   : > { %v1212_v13 = vadd.f32 %v1211_v12, %v1152_v4 }
 0xc85   : > { %v1551_v14 = vpop.f32.mrf.mxu1 }
 0xc86   : > { %v1223_v7 = vadd.f32 %v1440_v11, %v1212_v13 }
 0xc88   : > { %v1224_v17 = vpack.c.bf16 %v1223_v7, %v1222_v15 }
 0xc8a   : > { %1557 = vmatmul.mubr.msk.bf16.vlgmr.msra.gmra.mxu0 %vm660_vm3, %v1224_v17 }
 0xd4a   : > { %v1285_v8 = vpop.f32.mrf.mxu0 }
 0xd4b   : > { %v1286_v20 = vadd.f32 %v1441_v2, %v1285_v8 }
 0xd4c   : > { %v1558_v21 = vpop.f32.mrf.mxu0 }
 0xd4d   : > { %1292 = vst.msk [vmem:[#allocation11] sm:$0xff] %vm425_vm2, %v1286_v20 }
 0xd4e   : > { %v1288_v22 = vpop.f32.mrf.mxu0 }
 0xd4f   : > { %v1289_v23 = vadd.f32 %v1441_v2, %v1288_v22 }
 0xd50   : > { %v1559_v24 = vpop.f32.mrf.mxu0 }
 0xd51   : > { %1293 = vst.msk [vmem:[#allocation11 + $0x8] sm:$0xff] %vm425_vm2, %v1289_v23 }
 0xd52 PF: > { %s2306_s26 = sadd.s32 4294967295, %s1896_s14   ;;  %s1913_s24 = smov [#allocation11]  }
 0xd53   : > { %p2249_p4 = scmp.eq.s32.totalorder %s2306_s26, 1  ;;  %s1303_s28 = sshll.u32 %s1913_s24, 4  ;;  %s1304_s28 = int_to_ptr.vmem [resolvable:$true] %s1303_s28 }
 0xd54   : > { %s1814_s15 = scalar_lea.vmem %s1304_s28, 256  ;;  %p1821_p10 = scmp.lt.s32.totalorder %s1304_s28, %s1304_s28 }
 0xd55   : > { %p1815_p3 = scmp.ne.s32.totalorder %s1304_s28, %s1814_s15  ;;  %p1822_p11 = scmp.lt.s32.totalorder %s1814_s15, %s1814_s15 }
 0xd57   : > { %p1816_p6 = pnand %p1815_p3, %p2249_p4  ;;  %p1823_p12 = por %p1822_p11, %p1821_p10 }
 0xd59   : > { %p1817_p7 = pneg %p1816_p6 }
 0xd5b   : > { %p1824_p13 = pnand %p1823_p12, %p1817_p7 }
 0xd5d   : > { %1827 = shalt.err (!%p1824_p13)
}
 0xd5e   : > { %s1914_s27 = smov 128   ;;  %s1915_s21 = smov 8  }
 0xd5f   : > { %1571 = dma.vmem_to_hbm [thread:$0]  (%p2249_p4), %s1304_s28, 256, %s2291_s9, [#allocation7], %s1914_s27, %s1914_s27, %s1915_s21  }
 0xd60   : > { %1871 = dma.done.wait (%p2249_p4), [#allocation7], 256  }
 0xd61   : > { %1873 = vsyncadd (%p2249_p4), [#allocation7], 4294967040 }
 0xd62 PF: > { %s24_s14 = sadd.s32 1, %s1896_s14   ;;  %s2308_s30 = smov %s1880_s10 }
 0xd63   : > { %p21_p8 = scmp.ge.s32.totalorder %s24_s14, 4   ;;  %s2309_s10 = smov %s1884_s11 }
 0xd64   : > { %s2310_s11 = smov %s2059_s29  ;;  %s2311_s12 = smov %s1892_s13 }
 0xd65   : > { %s2312_s13 = smov %s2314_s20  ;;  %23 = sbr.rel (!%p21_p8) target bundleno = 9 (0x9), region = 116 }
 0xd6a   :  { %1319 = vsyncpa [#allocation6], 1 }
 0xd6b   :  { %1321 = vsyncpa [#allocation6 + $0x1], 1 }
 0xd6c   :  { %1322 = vsyncpa [#allocation9], 1 }
 0xd6d   :  { %1323 = vsyncpa [#allocation7], 1 }
 0xd6e   :  { %1325 = vsyncpa [#allocation7 + $0x1], 1 }

</bundles_post_ra>
